<compile_context>
chip_gen: v6e
topology: v6e:2x2x1
jax: 0.10.0
libtpu: 0.0.40
codegen_flags: <defaults>
</compile_context>

<pallas_src>
import jax
import jax.numpy as jnp
from jax.experimental import pallas as pl
from jax.experimental.pallas import tpu as pltpu


def rope_kernel(pos_ref, inv_ref, cos_ref, sin_ref):
    # pos_ref: (TS, 1) int32 (sublane-major positions)
    # inv_ref: (1, half) float32 (resident across the whole grid)
    # cos_ref / sin_ref: (TS, dim) out dtype, dim = 2*half
    # NOTE: f32 cast of positions is exact up to 2^24 — fine for any realistic
    # context length (the PyTorch module does the same .float() cast).
    pos = pos_ref[...].astype(jnp.float32)        # (TS, 1)
    inv = inv_ref[...]                            # (1, half)
    freqs = pos * inv                             # (TS, half) — VPU broadcast mul

    # Transcendentals at half width in f32 (cheapest EUP path, incl. v5e),
    # cast to out dtype BEFORE the duplicate-concat so the XLU concat and the
    # stores carry half the bytes. Concat rides the otherwise-idle XLU slot.
    cos_h = jnp.cos(freqs).astype(cos_ref.dtype)  # (TS, half)
    sin_h = jnp.sin(freqs).astype(sin_ref.dtype)  # (TS, half)

    cos_ref[...] = jnp.concatenate([cos_h, cos_h], axis=-1)
    sin_ref[...] = jnp.concatenate([sin_h, sin_h], axis=-1)


def llama_rotary_embedding(position_ids, inv_freq, *, out_dtype, ts=2048):
    """position_ids: (B, S) int; inv_freq: (half,) float32.
    Returns (cos, sin), each (B, S, 2*half) in out_dtype."""
    B, S = position_ids.shape
    half = inv_freq.shape[0]
    dim = 2 * half
    T = B * S                                     # flat token axis

    # Token tile: either the full T or a multiple of 8 (satisfies the (8,128)
    # sublane constraint either way). cdiv grid + edge-block clipping handles
    # ragged tails. Keep ts modest so the grid has >=2 steps at realistic B*S
    # (megacore sharding on v7x + output-DMA/compute overlap).
    if ts >= T:
        ts = T
    else:
        ts = max(8, (ts // 8) * 8)

    pos_in = position_ids.astype(jnp.int32).reshape(T, 1)   # sublane-major
    inv_2d = inv_freq.reshape(1, half).astype(jnp.float32)

    out_shape = (
        jax.ShapeDtypeStruct((T, dim), out_dtype),
        jax.ShapeDtypeStruct((T, dim), out_dtype),
    )

    # NOTE: for dim < 128 the stores are masked partial stores; standard Llama
    # head_dim=128 hits the lane-dense fast path.
    # TODO(synk): optional lane-dense repacking for dim < 128 if it ever matters.
    grid_spec = pltpu.PrefetchScalarGridSpec(
        num_scalar_prefetch=0,
        grid=(pl.cdiv(T, ts),),
        in_specs=[
            pl.BlockSpec((ts, 1), lambda t: (t, 0)),        # positions tile
            pl.BlockSpec((1, half), lambda t: (0, 0)),      # shared inv_freq
        ],
        out_specs=[
            pl.BlockSpec((ts, dim), lambda t: (t, 0)),
            pl.BlockSpec((ts, dim), lambda t: (t, 0)),
        ],
    )

    cos, sin = pl.pallas_call(
        rope_kernel,
        out_shape=out_shape,
        grid_spec=grid_spec,
        compiler_params=pltpu.CompilerParams(
            dimension_semantics=("parallel",),
        ),
    )(pos_in, inv_2d)
    return cos.reshape(B, S, dim), sin.reshape(B, S, dim)


def make_inv_freq(dim, base=10000.0):
    # inv_freq = 1 / base ** (arange(0, dim, 2) / dim)
    exps = jnp.arange(0, dim, 2, dtype=jnp.float32) / float(dim)
    return 1.0 / (float(base) ** exps)


def reference(position_ids, inv_freq, out_dtype):
    # Pure-JAX reference mirroring the PyTorch forward exactly.
    pos = position_ids.astype(jnp.float32)                     # (B, S)
    freqs = pos[:, :, None] * inv_freq[None, None, :]          # (B, S, half)
    emb = jnp.concatenate([freqs, freqs], axis=-1)             # (B, S, dim)
    return jnp.cos(emb).astype(out_dtype), jnp.sin(emb).astype(out_dtype)


if __name__ == "__main__":
    key = jax.random.PRNGKey(0)
    base = 10000.0
    max_position_embeddings = 512

    # ---- Test 1: small shapes, f32 output (x.dtype drives output dtype) ----
    B, S, dim = 2, 8, 32
    inv_freq = make_inv_freq(dim, base)                        # (dim//2,)
    k1, k2, k3 = jax.random.split(key, 3)
    x = jax.random.normal(k1, (B, 4, S, dim), dtype=jnp.float32)
    position_ids = jax.random.randint(
        k2, (B, S), 0, max_position_embeddings, dtype=jnp.int32)

    cos, sin = llama_rotary_embedding(position_ids, inv_freq, out_dtype=x.dtype)
    cos, sin = jax.block_until_ready((cos, sin))
    cos_ref, sin_ref = reference(position_ids, inv_freq, x.dtype)
    assert cos.shape == (B, S, dim) and sin.shape == (B, S, dim)
    assert cos.dtype == x.dtype and sin.dtype == x.dtype
    assert jnp.allclose(cos, cos_ref, atol=1e-5, rtol=1e-5)
    assert jnp.allclose(sin, sin_ref, atol=1e-5, rtol=1e-5)

    # ---- Test 2: ragged-tail multi-step grid (T % ts != 0), bf16 output ----
    B2, S2 = 2, 45                                             # T = 90, ts = 16
    pos2 = jax.random.randint(
        k3, (B2, S2), 0, max_position_embeddings, dtype=jnp.int32)
    cos2, sin2 = llama_rotary_embedding(
        pos2, inv_freq, out_dtype=jnp.bfloat16, ts=16)
    cos2, sin2 = jax.block_until_ready((cos2, sin2))
    cos2_ref, sin2_ref = reference(pos2, inv_freq, jnp.float32)
    assert cos2.dtype == jnp.bfloat16 and sin2.dtype == jnp.bfloat16
    assert jnp.allclose(cos2.astype(jnp.float32), cos2_ref, atol=1e-2, rtol=1e-2)
    assert jnp.allclose(sin2.astype(jnp.float32), sin2_ref, atol=1e-2, rtol=1e-2)

    print("KERNEL_OK")
</pallas_src>

<mosaic_0001>
module attributes {stable_mosaic.version = 11 : i64} {
  func.func @rope_kernel(%arg0: i32, %arg1: memref<16x1xi32, #tpu.memory_space<vmem>>, %arg2: memref<1x16xf32, #tpu.memory_space<vmem>>, %arg3: memref<16x32xf32, #tpu.memory_space<vmem>>, %arg4: memref<16x32xf32, #tpu.memory_space<vmem>>) attributes {dimension_semantics = [#tpu.dimension_semantics<parallel>], iteration_bounds = array<i64: 1>, scalar_prefetch = 0 : i64, scratch_operands = 0 : i64, tpu.core_type = #tpu.core_type<tc>, window_params = [{transform_indices = @transform_0, window_bounds = array<i64: 16, 1>}, {pipeline_mode = #tpu.pipeline_mode<synchronous>, transform_indices = @transform_1, window_bounds = array<i64: 1, 16>}, {transform_indices = @transform_2, window_bounds = array<i64: 16, 32>}, {transform_indices = @transform_3, window_bounds = array<i64: 16, 32>}]} {
    %c0 = arith.constant 0 : index
    %c0_0 = arith.constant 0 : index
    %0 = vector.load %arg1[%c0, %c0_0] : memref<16x1xi32, #tpu.memory_space<vmem>>, vector<16x1xi32>
    %1 = arith.sitofp %0 : vector<16x1xi32> to vector<16x1xf32>
    %c0_1 = arith.constant 0 : index
    %c0_2 = arith.constant 0 : index
    %2 = vector.load %arg2[%c0_1, %c0_2] : memref<1x16xf32, #tpu.memory_space<vmem>>, vector<1x16xf32>
    %3 = vector.broadcast %1 : vector<16x1xf32> to vector<16x16xf32>
    %4 = vector.broadcast %2 : vector<1x16xf32> to vector<16x16xf32>
    %5 = arith.mulf %3, %4 : vector<16x16xf32>
    %6 = math.cos %5 : vector<16x16xf32>
    %7 = math.sin %5 : vector<16x16xf32>
    %8 = tpu.concatenate %6, %6 in 1 : vector<16x16xf32>, vector<16x16xf32> -> vector<16x32xf32>
    %c0_3 = arith.constant 0 : index
    %c0_4 = arith.constant 0 : index
    %9 = vector.load %arg3[%c0_3, %c0_4] : memref<16x32xf32, #tpu.memory_space<vmem>>, vector<16x32xf32>
    tpu.vector_store %arg3[%c0_3, %c0_4], %8 {strides = array<i32>} : memref<16x32xf32, #tpu.memory_space<vmem>>, vector<16x32xf32>,
    %10 = tpu.concatenate %7, %7 in 1 : vector<16x16xf32>, vector<16x16xf32> -> vector<16x32xf32>
    %c0_5 = arith.constant 0 : index
    %c0_6 = arith.constant 0 : index
    %11 = vector.load %arg4[%c0_5, %c0_6] : memref<16x32xf32, #tpu.memory_space<vmem>>, vector<16x32xf32>
    tpu.vector_store %arg4[%c0_5, %c0_6], %10 {strides = array<i32>} : memref<16x32xf32, #tpu.memory_space<vmem>>, vector<16x32xf32>,
    return
  }
  func.func @transform_0(%arg0: i32) -> (i32, i32) {
    %c0_i32 = arith.constant 0 : i32
    %c0_i32_0 = arith.constant 0 : i32
    return %arg0, %c0_i32 : i32, i32
  }
  func.func @transform_1(%arg0: i32) -> (i32, i32) {
    %c0_i32 = arith.constant 0 : i32
    %c0_i32_0 = arith.constant 0 : i32
    %c0_i32_1 = arith.constant 0 : i32
    return %c0_i32, %c0_i32_0 : i32, i32
  }
  func.func @transform_2(%arg0: i32) -> (i32, i32) {
    %c0_i32 = arith.constant 0 : i32
    %c0_i32_0 = arith.constant 0 : i32
    return %arg0, %c0_i32 : i32, i32
  }
  func.func @transform_3(%arg0: i32) -> (i32, i32) {
    %c0_i32 = arith.constant 0 : i32
    %c0_i32_0 = arith.constant 0 : i32
    return %arg0, %c0_i32 : i32, i32
  }
}

</mosaic_0001>

<bundles_post_ra>
// kernel: tpu_custom_call.1
= control target key start
LH: loop header
LB: loop body
LE: loop exit
PB: predicated region body
PF: predicated region fallthrough
CT: control target
= control target key end

     0   :  { %9 = vsyncpa [#allocation3], 0  ;;  %v600_v2 = vmov 0   ;;  %s723_s0 = inlined_call_operand.vmem [shape: s32[16,1], index: 0, kind: input, shape index: {}]   ;;  %s724_s1 = inlined_call_operand.vmem [shape: f32[1,16], index: 1, kind: input, shape index: {}]   ;;  %s725_s2 = inlined_call_operand.hbm [shape: f32[16,32], index: 2, kind: output, shape index: {0}]   ;;  %s726_s3 = inlined_call_operand.hbm [shape: f32[16,32], index: 3, kind: output, shape index: {1}]  }
   0x1   :  { %v15_v0 = vld [vmem:[%s723_s0] sm:$0xff]  ;;  %v16_v1 = vld [vmem:[%s723_s0 + $0x8] sm:$0xff]  ;;  %547 = vset.pattern.permute.xlu0 %v600_v2 }
   0x2   :  { %v17_v3 = vcvt.s32.f32 %v15_v0 }
   0x3   :  { %10 = vsyncpa [#allocation5], 0  ;;  %v18_v4 = vcvt.s32.f32 %v16_v1  ;;  %v510_v5 = vld [vmem:[%s724_s1] ss:$0 sm:$0xff]  ;;  %v601_v26 = vmov 683565275  }
   0x4   :  { %22 = vperm.xlu0 %547, %v17_v3   ;;  %v602_v30 = vmov 2475754826   ;;  %v603_v32 = vmov 2131351028   ;;  %v604_v34 = vmov 2102212464  }
   0x5   :  { %v605_v36 = vmov 920167782   ;;  %v606_v43 = vmov 1326507024   ;;  %s607_s0 = smov 16   ;;  %s608_s1 = smov [#allocation2]  }
   0x6   :  { %s483_s18 = sshll.u32 %s608_s1, 4  ;;  %s609_s19 = smov [#allocation4]   ;;  %s484_s18 = int_to_ptr.vmem [resolvable:$true] %s483_s18 }
   0x7   :  { %s495_s20 = sshll.u32 %s609_s19, 4  ;;  %s556_s21 = scalar_lea.vmem %s484_s18, 256  ;;  %s496_s20 = int_to_ptr.vmem [resolvable:$true] %s495_s20 }
   0x8   :  { %27 = vperm.xlu0 %547, %v18_v4   ;;  %p557_p0 = scmp.ne.s32.totalorder %s484_s18, %s556_s21  ;;  %p561_p1 = scmp.lt.s32.totalorder %s484_s18, %s484_s18 }
   0x9   :  { %p562_p2 = scmp.lt.s32.totalorder %s556_s21, %s556_s21 }
   0xb   :  { %p563_p3 = por %p562_p2, %p561_p1 }
   0xd   :  { %p564_p4 = pnand %p563_p3, %p557_p0 }
  0x7f   :  { %v23_v6 = vpop.permute.xlu0 %22 }
  0x80   :  { %v641_v7 = vmul.f32 %v510_v5, %v23_v6 }
  0x82   :  { %v38_v8 = vand.u32 2147483647, %v641_v7  ;;  %v41_v9 = vand.u32 2139095040, %v641_v7  ;;  %vm40_vm14 = vcmp.lt.s32.totalorder %v641_v7, 0 }
  0x83   :  { %v28_v10 = vpop.permute.xlu0 %27 }
  0x84   :  { %v42_v11 = vshrl.u32 %v41_v9, 23  ;;  %v645_v12 = vmul.f32 %v510_v5, %v28_v10  ;;  %v45_v13 = vand.u32 8388607, %v38_v8  ;;  %vm39_vm15 = vcmp.le.f32.partialorder %v38_v8, 0.7853982 }
  0x86   :  { %v511_v14 = vadd.s32 4294967169, %v42_v11  ;;  %v144_v15 = vand.u32 2139095040, %v645_v12  ;;  %v46_v17 = vor.u32 8388608, %v45_v13  ;;  %v141_v19 = vand.u32 2147483647, %v645_v12 }
  0x88   :  { %v48_v16 = vadd.s32 1, %v511_v14  ;;  %v145_v18 = vshrl.u32 %v144_v15, 23  ;;  %v651_v24 = vshll.u32 %v46_v17, 8  ;;  %v148_v28 = vand.u32 8388607, %v141_v19 }
  0x8a   :  { %vm49_vm0 = vcmp.gt.s32.totalorder %v48_v16, 0  ;;  %v515_v21 = vadd.s32 4294967169, %v145_v18  ;;  %v149_v58 = vor.u32 8388608, %v148_v28 }
  0x8b   :  { %v50_v20 = vsel %vm49_vm0, %v48_v16, 0  ;;  %vm143_vm0 = vcmp.lt.s32.totalorder %v645_v12, 0 }
  0x8c   :  { %v51_v22 = vshrl.u32 %v50_v20, 5  ;;  %v52_v23 = vand.u32 31, %v50_v20  ;;  %v151_v29 = vadd.s32 1, %v515_v21  ;;  %v189_v9 = vshll.u32 %v149_v58, 8 }
  0x8e   :  { %v53_v25 = vsub.s32 32, %v52_v23  ;;  %v55_v27 = vshll.u32 %v601_v26, %v52_v23  ;;  %v58_v31 = vshll.u32 %v602_v30, %v52_v23  ;;  %v61_v33 = vshll.u32 %v603_v32, %v52_v23 }
  0x8f   :  { %v64_v35 = vshll.u32 %v604_v34, %v52_v23  ;;  %v67_v37 = vshll.u32 %v605_v36, %v52_v23  ;;  %vm70_vm1 = vcmp.lt.s32.totalorder %v51_v22, 1  ;;  %vm72_vm2 = vcmp.lt.s32.totalorder %v51_v22, 3 }
  0x90   :  { %v56_v38 = vshrl.u32 %v602_v30, %v53_v25  ;;  %v59_v39 = vshrl.u32 %v603_v32, %v53_v25  ;;  %v62_v40 = vshrl.u32 %v604_v34, %v53_v25  ;;  %v54_v41 = vshrl.u32 %v601_v26, %v53_v25 }
  0x91   :  { %v65_v42 = vshrl.u32 %v605_v36, %v53_v25  ;;  %v68_v44 = vshrl.u32 %v606_v43, %v53_v25  ;;  %vm152_vm3 = vcmp.gt.s32.totalorder %v151_v29, 0  ;;  %vm73_vm4 = vcmp.lt.s32.totalorder %v51_v22, 4 }
  0x92   :  { %v57_v45 = vor.u32 %v56_v38, %v55_v27  ;;  %v60_v46 = vor.u32 %v59_v39, %v58_v31  ;;  %v63_v47 = vor.u32 %v62_v40, %v61_v33  ;;  %v153_v50 = vsel %vm152_vm3, %v151_v29, 0 }
  0x93   :  { %v66_v48 = vor.u32 %v65_v42, %v64_v35  ;;  %v69_v49 = vor.u32 %v68_v44, %v67_v37  ;;  %vm71_vm5 = vcmp.lt.s32.totalorder %v51_v22, 2  ;;  %v155_v61 = vand.u32 31, %v153_v50 }
  0x94   :  { %v74_v51 = vsel %vm70_vm1, %v54_v41, %v57_v45  ;;  %v75_v52 = vsel %vm73_vm4, %v63_v47, 2102212464  ;;  %v78_v53 = vsel %vm70_vm1, %v57_v45, %v60_v46  ;;  %v82_v54 = vsel %vm70_vm1, %v60_v46, %v63_v47 }
  0x95   :  { %v76_v55 = vsel %vm72_vm2, %v60_v46, %v75_v52  ;;  %v79_v56 = vsel %vm73_vm4, %v66_v48, 920167782  ;;  %v83_v57 = vsel %vm73_vm4, %v69_v49, 1326507024  ;;  %v154_v5 = vshrl.u32 %v153_v50, 5 }
  0x96   :  { %v80_v59 = vsel %vm72_vm2, %v63_v47, %v79_v56  ;;  %v84_v60 = vsel %vm72_vm2, %v66_v48, %v83_v57  ;;  %v77_v62 = vsel %vm71_vm5, %v74_v51, %v76_v55  ;;  %v156_v6 = vsub.s32 32, %v155_v61 }
  0x97   :  { %v81_v63 = vsel %vm71_vm5, %v78_v53, %v80_v59  ;;  %v85_v0 = vsel %vm71_vm5, %v82_v54, %v84_v60  ;;  %v93_v10 = vmul.u32 %v651_v24, %v77_v62  ;;  %v158_v11 = vshll.u32 %v601_v26, %v155_v61 }
  0x98   :  { %v664_v1 = vmul.u32.u64.low %v651_v24, %v85_v0  ;;  %v665_v2 = vmul.u32.u64.high %v651_v24, %v85_v0, %v664_v1  ;;  %v668_v3 = vmul.u32.u64.low %v651_v24, %v81_v63  ;;  %v669_v4 = vmul.u32.u64.high %v651_v24, %v81_v63, %v668_v3 }
  0x99   :  { %v161_v13 = vshll.u32 %v602_v30, %v155_v61  ;;  %v164_v14 = vshll.u32 %v603_v32, %v155_v61  ;;  %v159_v15 = vshrl.u32 %v602_v30, %v156_v6  ;;  %v162_v16 = vshrl.u32 %v603_v32, %v156_v6 }
  0x9a   :  { %v165_v17 = vshrl.u32 %v604_v34, %v156_v6  ;;  %v167_v18 = vshll.u32 %v604_v34, %v155_v61  ;;  %vm95_vm6 = vc.u32 %v665_v2, %v668_v3  ;;  %v96_v20 = vadd.s32 1, %v669_v4 }
  0x9b   :  { %v168_v21 = vshrl.u32 %v605_v36, %v156_v6  ;;  %v170_v22 = vshll.u32 %v605_v36, %v155_v61  ;;  %v160_v23 = vor.u32 %v159_v15, %v158_v11  ;;  %v163_v25 = vor.u32 %v162_v16, %v161_v13 }
  0x9c   :  { %v166_v27 = vor.u32 %v165_v17, %v164_v14  ;;  %v171_v28 = vshrl.u32 %v606_v43, %v156_v6  ;;  %v97_v24 = vsel %vm95_vm6, %v96_v20, %v669_v4  ;;  %vm173_vm7 = vcmp.lt.s32.totalorder %v154_v5, 1 }
  0x9d   :  { %v169_v29 = vor.u32 %v168_v21, %v167_v18  ;;  %vm176_vm8 = vcmp.lt.s32.totalorder %v154_v5, 4  ;;  %v98_v30 = vadd.s32 %v97_v24, %v93_v10  ;;  %vm175_vm9 = vcmp.lt.s32.totalorder %v154_v5, 3 }
  0x9e   :  { %v172_v31 = vor.u32 %v171_v28, %v170_v22  ;;  %v178_v32 = vsel %vm176_vm8, %v166_v27, 2102212464  ;;  %v157_v33 = vshrl.u32 %v601_v26, %v156_v6  ;;  %v181_v34 = vsel %vm173_vm7, %v160_v23, %v163_v25 }
  0x9f   :  { %v182_v35 = vsel %vm176_vm8, %v169_v29, 920167782  ;;  %v185_v37 = vsel %vm173_vm7, %v163_v25, %v166_v27  ;;  %v99_v38 = vadd.s32 536870912, %v98_v30  ;;  %vm174_vm10 = vcmp.lt.s32.totalorder %v154_v5, 2 }
  0xa0   :  { %v183_v36 = vsel %vm175_vm9, %v166_v27, %v182_v35  ;;  %v186_v39 = vsel %vm176_vm8, %v172_v31, 1326507024  ;;  %v177_v40 = vsel %vm173_vm7, %v157_v33, %v160_v23  ;;  %v179_v41 = vsel %vm175_vm9, %v163_v25, %v178_v32 }
  0xa1   :  { %v184_v42 = vsel %vm174_vm10, %v181_v34, %v183_v36  ;;  %v187_v43 = vsel %vm175_vm9, %v169_v29, %v186_v39  ;;  %v100_v44 = vshrl.u32 %v99_v38, 30  ;;  %v180_v50 = vsel %vm174_vm10, %v177_v40, %v179_v41 }
  0xa2   :  { %v188_v45 = vsel %vm174_vm10, %v185_v37, %v187_v43  ;;  %v679_v46 = vmul.u32.u64.low %v189_v9, %v184_v42  ;;  %v680_v47 = vmul.u32.u64.high %v189_v9, %v184_v42, %v679_v46  ;;  %v196_v53 = vmul.u32 %v189_v9, %v180_v50 }
  0xa3   :  { %v682_v48 = vmul.u32.u64.low %v189_v9, %v188_v45  ;;  %v683_v49 = vmul.u32.u64.high %v189_v9, %v188_v45, %v682_v48  ;;  %v101_v26 = vshll.u32 %v100_v44, 30  ;;  %v94_v1 = vadd.s32 %v668_v3, %v665_v2 }
  0xa4   :  { %v199_v52 = vadd.s32 1, %v680_v47  ;;  %vm698_vm1 = vcmp.le.f32.partialorder %v141_v19, 0.7853982  ;;  %vm130_vm8 = vweird.f32 %v641_v7 }
  0xa5   :  { %v102_v51 = vsub.s32 %v98_v30, %v101_v26  ;;  %vm198_vm11 = vc.u32 %v683_v49, %v679_v46  ;;  %v197_v25 = vadd.s32 %v679_v46, %v683_v49  ;;  %v124_v30 = vsub.s32 4, %v100_v44 }
  0xa6   :  { %v200_v55 = vsel %vm198_vm11, %v199_v52, %v680_v47 }
  0xa7   :  { %v104_v54 = vsub.s32 0, %v102_v51  ;;  %v201_v56 = vadd.s32 %v200_v55, %v196_v53  ;;  %v125_v37 = vsel %vm40_vm14, %v124_v30, %v100_v44 }
  0xa8   :  { %v127_v39 = vsel %vm39_vm15, 0, %v125_v37 }
  0xa9   :  { %v512_v57 = vmin.u32 %v104_v54, %v102_v51  ;;  %v202_v58 = vadd.s32 536870912, %v201_v56  ;;  %v337_v42 = vadd.s32 3, %v127_v39  ;;  %v131_v47 = vand.u32 3, %v127_v39 }
  0xab   :  { %v106_v59 = vclz %v512_v57  ;;  %v203_v60 = vshrl.u32 %v202_v58, 30  ;;  %v338_v46 = vand.u32 3, %v337_v42  ;;  %vm133_vm3 = vcmp.eq.s32.totalorder %v131_v47, 0 }
  0xac   :  { %vm136_vm4 = vcmp.eq.s32.totalorder %v131_v47, 2  ;;  %vm132_vm7 = vcmp.lt.s32.totalorder %v131_v47, 2 }
  0xad   :  { %v513_v61 = vadd.s32 4294967294, %v106_v59  ;;  %v204_v62 = vshll.u32 %v203_v60, 30  ;;  %v227_v45 = vsub.s32 4, %v203_v60  ;;  %vm343_vm2 = vcmp.eq.s32.totalorder %v338_v46, 2 }
  0xae   :  { %vm340_vm5 = vcmp.eq.s32.totalorder %v338_v46, 0  ;;  %vm339_vm6 = vcmp.lt.s32.totalorder %v338_v46, 2 }
  0xaf   :  { %vm514_vm12 = vcmp.lt.s32.totalorder %v513_v61, 0  ;;  %v205_v0 = vsub.s32 %v201_v56, %v204_v62  ;;  %v228_v49 = vsel %vm143_vm0, %v227_v45, %v203_v60 }
  0xb0   :  { %v109_v63 = vsel %vm514_vm12, 0, %v513_v61  ;;  %v230_v53 = vsel %vm698_vm1, 0, %v228_v49 }
  0xb1   :  { %v110_v4 = vsub.s32 32, %v109_v63  ;;  %v114_v5 = vsub.s32 4294967266, %v109_v63  ;;  %v207_v6 = vsub.s32 0, %v205_v0  ;;  %v111_v9 = vshll.u32 %v102_v51, %v109_v63 }
  0xb2   :  { %v441_v60 = vadd.s32 3, %v230_v53  ;;  %v234_v61 = vand.u32 3, %v230_v53 }
  0xb3   :  { %v112_v10 = vshrl.u32 %v94_v1, %v110_v4  ;;  %v115_v11 = vadd.s32 127, %v114_v5  ;;  %v516_v13 = vmin.u32 %v207_v6, %v205_v0 }
  0xb4   :  { %v442_v62 = vand.u32 3, %v441_v60  ;;  %vm239_vm9 = vcmp.eq.s32.totalorder %v234_v61, 2  ;;  %vm236_vm10 = vcmp.eq.s32.totalorder %v234_v61, 0 }
  0xb5   :  { %v113_v14 = vor.u32 %v112_v10, %v111_v9  ;;  %v116_v15 = vshll.u32 %v115_v11, 23  ;;  %v209_v16 = vclz %v516_v13 }
  0xb6   :  { %vm444_vm11 = vcmp.eq.s32.totalorder %v442_v62, 0  ;;  %vm447_vm12 = vcmp.eq.s32.totalorder %v442_v62, 2 }
  0xb7   :  { %v117_v17 = vor.u32 4788187, %v116_v15  ;;  %v517_v18 = vadd.s32 4294967294, %v209_v16  ;;  %v120_v21 = vcvt.s32.f32 %v113_v14 }
  0xb9   :  { %v118_v20 = vand.u32 2147483647, %v117_v17  ;;  %vm518_vm13 = vcmp.lt.s32.totalorder %v517_v18, 0 }
  0xba   :  { %v212_v23 = vsel %vm518_vm13, 0, %v517_v18  ;;  %vm235_vm13 = vcmp.lt.s32.totalorder %v234_v61, 2 }
  0xbb   :  { %v121_v22 = vmul.f32 %v120_v21, %v118_v20  ;;  %v213_v2 = vsub.s32 32, %v212_v23  ;;  %v217_v3 = vsub.s32 4294967266, %v212_v23  ;;  %v214_v28 = vshll.u32 %v205_v0, %v212_v23 }
  0xbd   :  { %v122_v27 = vxor.u32 2147483648, %v121_v22  ;;  %v215_v24 = vshrl.u32 %v197_v25, %v213_v2  ;;  %v218_v29 = vadd.s32 127, %v217_v3 }
  0xbf   :  { %v123_v31 = vsel %vm40_vm14, %v122_v27, %v121_v22  ;;  %v216_v32 = vor.u32 %v215_v24, %v214_v28  ;;  %v219_v33 = vshll.u32 %v218_v29, 23  ;;  %vm233_vm14 = vweird.f32 %v645_v12 }
  0xc0   :  { %v126_v34 = vsel %vm39_vm15, %v641_v7, %v123_v31  ;;  %vm443_vm15 = vcmp.lt.s32.totalorder %v442_v62, 2 }
  0xc1   :  { %548 = vcosq.f32 %v126_v34  ;;  %v220_v35 = vor.u32 4788187, %v219_v33  ;;  %v223_v36 = vcvt.s32.f32 %v216_v32 }
  0xc2   :  { %550 = vsinq.f32 %v126_v34 }
  0xc3   :  { %v221_v38 = vand.u32 2147483647, %v220_v35 }
  0xc5   :  { %v224_v40 = vmul.f32 %v223_v36, %v221_v38 }
  0xc7   :  { %v225_v41 = vxor.u32 2147483648, %v224_v40 }
  0xc9   :  { %v226_v43 = vsel %vm143_vm0, %v225_v41, %v224_v40  ;;  %vm460_vm0 = vcmask 130048  }
  0xca   :  { %v229_v44 = vsel %vm698_vm1, %v645_v12, %v226_v43  ;;  %vm463_vm1 = vcmask 261120  }
  0xcb   :  { %552 = vcosq.f32 %v229_v44 }
  0xcc   :  { %554 = vsinq.f32 %v229_v44 }
  0xce   :  { %v549_v48 = vpop.eup %548 }
  0xcf   :  { %v551_v26 = vpop.eup %550  ;;  %v137_v50 = vxor.u32 2147483648, %v549_v48 }
  0xd0   :  { %v134_v51 = vxor.u32 2147483648, %v551_v26 }
  0xd1   :  { %v345_v19 = vsel %vm343_vm2, %v137_v50, %v551_v26  ;;  %v138_v52 = vsel %vm136_vm4, %v137_v50, %v551_v26 }
  0xd2   :  { %v342_v54 = vsel %vm340_vm5, %v549_v48, %v134_v51  ;;  %v135_v55 = vsel %vm133_vm3, %v549_v48, %v134_v51 }
  0xd3   :  { %v346_v56 = vsel %vm339_vm6, %v342_v54, %v345_v19  ;;  %v139_v57 = vsel %vm132_vm7, %v135_v55, %v138_v52 }
  0xd4   :  { %v347_v58 = vsel %vm130_vm8, nan, %v346_v56  ;;  %v140_v59 = vsel %vm130_vm8, nan, %v139_v57 }
  0xd5   :  { %468 = vrot.lane.b32.xlu0 %v347_v58, %s607_s0  ;;  %454 = vrot.lane.b32.xlu1 %v140_v59, %s607_s0 }
  0xd8   :  { %v553_v63 = vpop.eup %552 }
  0xd9   :  { %v555_v0 = vpop.eup %554  ;;  %v240_v1 = vxor.u32 2147483648, %v553_v63 }
  0xda   :  { %v237_v4 = vxor.u32 2147483648, %v555_v0 }
  0xdb   :  { %v241_v5 = vsel %vm239_vm9, %v240_v1, %v555_v0  ;;  %v449_v9 = vsel %vm447_vm12, %v240_v1, %v555_v0 }
  0xdc   :  { %v238_v7 = vsel %vm236_vm10, %v553_v63, %v237_v4  ;;  %v446_v6 = vsel %vm444_vm11, %v553_v63, %v237_v4 }
  0xdd   :  { %v242_v10 = vsel %vm235_vm13, %v238_v7, %v241_v5  ;;  %v450_v13 = vsel %vm443_vm15, %v446_v6, %v449_v9 }
  0xde   :  { %v243_v11 = vsel %vm233_vm14, nan, %v242_v10  ;;  %v451_v14 = vsel %vm233_vm14, nan, %v450_v13 }
  0xdf   :  { %456 = vrot.lane.b32.xlu1 %v243_v11, %s607_s0 }
  0xe3   :  { %470 = vrot.lane.b32.xlu1 %v451_v14, %s607_s0 }
 0x147   :  { %v455_v15 = vpop.permute.xlu1 %454  ;;  %v469_v16 = vpop.permute.xlu0 %468 }
 0x148   :  { %v461_v17 = vsel %vm460_vm0, %v140_v59, %v455_v15  ;;  %v474_v18 = vsel %vm460_vm0, %v347_v58, %v469_v16 }
 0x149   :  { %464 = vst.msk [vmem:[#allocation2] sm:$0xff] %vm463_vm1, %v461_v17  ;;  %476 = vst.msk [vmem:[#allocation4] sm:$0xff] %vm463_vm1, %v474_v18 }
 0x151   :  { %v457_v12 = vpop.permute.xlu1 %456 }
 0x152   :  { %v462_v20 = vsel %vm460_vm0, %v243_v11, %v457_v12 }
 0x153   :  { %465 = vst.msk [vmem:[#allocation2 + $0x8] sm:$0xff] %vm463_vm1, %v462_v20 }
 0x154   :  { %567 = shalt.err (!%p564_p4)
}
 0x155   :  { %s610_s22 = smov 128   ;;  %s611_s23 = smov 8   ;;  %v471_v21 = vpop.permute.xlu1 %470 }
 0x156   :  { %489 = dma.vmem_to_hbm [thread:$0]  %s484_s18, 256, %s725_s2, [#allocation3], %s610_s22, %s610_s22, %s611_s23   ;;  %v475_v22 = vsel %vm460_vm0, %v451_v14, %v471_v21 }
 0x157   :  { %477 = vst.msk [vmem:[#allocation4 + $0x8] sm:$0xff] %vm463_vm1, %v475_v22  ;;  %s576_s26 = scalar_lea.vmem %s496_s20, 256  ;;  %p581_p6 = scmp.lt.s32.totalorder %s496_s20, %s496_s20 }
 0x158   :  { %p577_p5 = scmp.ne.s32.totalorder %s496_s20, %s576_s26  ;;  %p582_p7 = scmp.lt.s32.totalorder %s576_s26, %s576_s26 }
 0x15a   :  { %p583_p8 = por %p582_p7, %p581_p6 }
 0x15c   :  { %p584_p9 = pnand %p583_p8, %p577_p5 }
 0x15e   :  { %587 = shalt.err (!%p584_p9)
}
 0x15f   :  { %501 = dma.vmem_to_hbm [thread:$0]  %s496_s20, 256, %s726_s3, [#allocation5], %s610_s22, %s610_s22, %s611_s23  }
 0x160   :  { %596 = dma.done.wait [#allocation3], 256  }
 0x161   :  { %597 = vsyncadd [#allocation3], 4294967040 }
 0x162   :  { %598 = dma.done.wait [#allocation5], 256  }
 0x163   :  { %599 = vsyncadd [#allocation5], 4294967040 }
 0x164   :  { %508 = vsyncpa [#allocation3], 1 }
 0x165   :  { %509 = vsyncpa [#allocation5], 1 }

</bundles_post_ra>
